<compile_context>
chip_gen: v7x
topology: tpu7x:2x2x1
jax: 0.10.0
libtpu: 0.0.40
codegen_flags: <defaults>
</compile_context>

<pallas_src>
import functools

import jax
import jax.numpy as jnp
from jax.experimental import pallas as pl
from jax.experimental.pallas import tpu as pltpu


def attention_kernel(x_kv_ref, x_q_ref, wq_ref, wk_ref, wv_ref,
                     pre_ref, post_ref, wo_ref, bo_ref, o_ref,
                     k_scratch, v_scratch, *, heads, dim_head):
    inner = heads * dim_head
    nq = x_q_ref.shape[1]

    # ---- Once per batch element (query-tile 0): project K, V for the full
    # sequence into VMEM scratch; every query tile reuses them. --------------
    @pl.when(pl.program_id(1) == 0)
    def _():
        xf = x_kv_ref[0]                                              # (N, DIM)
        k_scratch[...] = jnp.dot(
            xf, wk_ref[...], preferred_element_type=jnp.float32
        ).astype(k_scratch.dtype)
        v_scratch[...] = jnp.dot(
            xf, wv_ref[...], preferred_element_type=jnp.float32
        ).astype(v_scratch.dtype)

    # ---- Q projection for this query tile (MXU). ---------------------------
    xq = x_q_ref[0]                                                   # (Nq, DIM)
    q = jnp.dot(xq, wq_ref[...], preferred_element_type=jnp.float32)  # (Nq, inner)

    # ---- Pre-softmax talking-heads + scale folded into Q. ------------------
    # pre_ref[g, h*dh + d] = mix_pre[h, g] * scale, so
    #   logits[g, i, j] = sum_{h,d} mix_pre[h,g]*scale * q[i,h*dh+d] * k[j,h*dh+d]
    # i.e. one (heads*Nq, inner) x (inner, N) MXU matmul for all heads.
    pre = pre_ref[...].astype(jnp.float32)                            # (H, inner)
    q_mix = (q[None, :, :] * pre[:, None, :]).reshape(heads * nq, inner)
    q_mix = q_mix.astype(x_q_ref.dtype)

    k = k_scratch[...]
    logits = jnp.dot(q_mix, k.T, preferred_element_type=jnp.float32)  # (H*Nq, N)

    # ---- Row-wise softmax (each row is one (head, query) pair). ------------
    m = jnp.max(logits, axis=-1, keepdims=True)
    e = jnp.exp(logits - m)
    l = jnp.sum(e, axis=-1, keepdims=True)
    # approx=True is faster (pure EUP) but would loosen the self-test tolerance.
    probs = e * pl.reciprocal(l, approx=False)                        # (H*Nq, N)

    # ---- probs @ V as one MXU matmul across all heads. ---------------------
    v = v_scratch[...]
    pv = jnp.dot(probs.astype(v.dtype), v,
                 preferred_element_type=jnp.float32)                  # (H*Nq, inner)

    # ---- Post-softmax talking-heads: per-head rescale + sum over heads. ----
    # post_ref[h, g*dh + d] = mix_post[h, g]
    post = post_ref[...].astype(jnp.float32)                          # (H, inner)
    out = jnp.sum(pv.reshape(heads, nq, inner) * post[:, None, :], axis=0)

    # ---- Output projection + bias (Dropout(p=0.0) is identity). ------------
    y = jnp.dot(out.astype(wo_ref.dtype), wo_ref[...],
                preferred_element_type=jnp.float32)
    y = y + bo_ref[...].astype(jnp.float32)
    o_ref[0] = y.astype(o_ref.dtype)


def _pick_q_block(n):
    """Largest convenient query tile: whole sequence if small, else 256/128."""
    if n <= 256:
        return n
    for t in (256, 128):
        if n % t == 0:
            return t
    return n


def cait_attention(x, wq, wkv, mix_pre, mix_post, wo, bo, *, heads, dim_head,
                   q_block=None):
    B, N, DIM = x.shape
    inner = heads * dim_head
    scale = dim_head ** (-0.5)

    # One-time parameter prep (tiny, outside the hot loop):
    #  - split the fused kv weight so the kernel never lane-slices at `inner`,
    #  - expand the (heads, heads) mix matrices into per-feature coefficient rows.
    wk = wkv[:, :inner]
    wv = wkv[:, inner:]
    pre_coef = jnp.repeat(mix_pre.T * scale, dim_head, axis=1)   # (H, inner)
    post_coef = jnp.repeat(mix_post, dim_head, axis=1)           # (H, inner)

    if q_block is None:
        q_block = _pick_q_block(N)
    assert N % q_block == 0, "query tile must divide the sequence length"
    grid = (B, N // q_block)

    kernel = functools.partial(attention_kernel, heads=heads, dim_head=dim_head)

    return pl.pallas_call(
        kernel,
        out_shape=jax.ShapeDtypeStruct((B, N, DIM), x.dtype),
        grid_spec=pltpu.PrefetchScalarGridSpec(
            num_scalar_prefetch=0,
            grid=grid,
            in_specs=[
                # x (full sequence) for the K/V projection: same block for every
                # query tile -> only DMA'd when the batch index changes.
                pl.BlockSpec((1, N, DIM), lambda b, t: (b, 0, 0)),
                # x (query tile).
                pl.BlockSpec((1, q_block, DIM), lambda b, t: (b, t, 0)),
                pl.BlockSpec((DIM, inner), lambda b, t: (0, 0)),      # wq
                pl.BlockSpec((DIM, inner), lambda b, t: (0, 0)),      # wk
                pl.BlockSpec((DIM, inner), lambda b, t: (0, 0)),      # wv
                pl.BlockSpec((heads, inner), lambda b, t: (0, 0)),    # pre_coef
                pl.BlockSpec((heads, inner), lambda b, t: (0, 0)),    # post_coef
                pl.BlockSpec((inner, DIM), lambda b, t: (0, 0)),      # wo
                pl.BlockSpec((1, DIM), lambda b, t: (0, 0)),          # bo
            ],
            out_specs=pl.BlockSpec((1, q_block, DIM), lambda b, t: (b, t, 0)),
            scratch_shapes=[
                pltpu.VMEM((N, inner), x.dtype),    # K (full sequence)
                pltpu.VMEM((N, inner), x.dtype),    # V (full sequence)
            ],
        ),
        compiler_params=pltpu.CompilerParams(
            # Batch axis is independent (megacore-shardable); the query-tile
            # axis carries the K/V-scratch reuse, so it stays "arbitrary".
            dimension_semantics=("parallel", "arbitrary")),
    )(x, x, wq, wk, wv, pre_coef, post_coef, wo, bo)


def reference_attention(x, wq, wkv, mix_pre, mix_post, wo, bo, *, heads, dim_head):
    """Pure-JAX reference mirroring the PyTorch forward (context=None)."""
    B, N, DIM = x.shape
    inner = heads * dim_head
    scale = dim_head ** (-0.5)

    with jax.default_matmul_precision("float32"):
        q = x @ wq                                                   # (B, N, inner)
        kv = x @ wkv                                                 # (B, N, 2*inner)
        k, v = kv[..., :inner], kv[..., inner:]

        def split_heads(t):
            return t.reshape(B, N, heads, dim_head).transpose(0, 2, 1, 3)

        q, k, v = map(split_heads, (q, k, v))
        dots = jnp.einsum('bhid,bhjd->bhij', q, k) * scale
        dots = jnp.einsum('bhij,hg->bgij', dots, mix_pre)
        attn = jax.nn.softmax(dots, axis=-1)
        attn = jnp.einsum('bhij,hg->bgij', attn, mix_post)
        out = jnp.einsum('bhij,bhjd->bhid', attn, v)
        out = out.transpose(0, 2, 1, 3).reshape(B, N, inner)
        return out @ wo + bo


if __name__ == "__main__":
    B, N, DIM = 2, 8, 32
    HEADS, DIM_HEAD = 4, 16
    INNER = HEADS * DIM_HEAD

    key = jax.random.PRNGKey(0)
    kx, kq, kkv, kp1, kp2, ko, kb = jax.random.split(key, 7)

    x = jax.random.normal(kx, (B, N, DIM), dtype=jnp.float32)
    # Linear weights stored already transposed ((in, out)) so the kernel does x @ W.
    wq = jax.random.normal(kq, (DIM, INNER), dtype=jnp.float32) * 0.05
    wkv = jax.random.normal(kkv, (DIM, 2 * INNER), dtype=jnp.float32) * 0.05
    mix_pre = jax.random.normal(kp1, (HEADS, HEADS), dtype=jnp.float32)
    mix_post = jax.random.normal(kp2, (HEADS, HEADS), dtype=jnp.float32)
    wo = jax.random.normal(ko, (INNER, DIM), dtype=jnp.float32) * 0.05
    bo = jax.random.normal(kb, (1, DIM), dtype=jnp.float32) * 0.05

    y = cait_attention(x, wq, wkv, mix_pre, mix_post, wo, bo,
                       heads=HEADS, dim_head=DIM_HEAD)
    y = jax.block_until_ready(y)

    y_ref = reference_attention(x, wq, wkv, mix_pre, mix_post, wo, bo,
                                heads=HEADS, dim_head=DIM_HEAD)

    assert y.shape == (B, N, DIM)
    assert jnp.allclose(y, y_ref, rtol=1e-3, atol=1e-3), "mismatch vs reference"
    print("KERNEL_OK")
</pallas_src>

<mosaic_0001>
module attributes {stable_mosaic.version = 11 : i64} {
  func.func @attention_kernel(%arg0: i32, %arg1: i32, %arg2: memref<1x8x32xf32, #tpu.memory_space<vmem>>, %arg3: memref<1x8x32xf32, #tpu.memory_space<vmem>>, %arg4: memref<32x64xf32, #tpu.memory_space<vmem>>, %arg5: memref<32x64xf32, #tpu.memory_space<vmem>>, %arg6: memref<32x64xf32, #tpu.memory_space<vmem>>, %arg7: memref<4x64xf32, #tpu.memory_space<vmem>>, %arg8: memref<4x64xf32, #tpu.memory_space<vmem>>, %arg9: memref<64x32xf32, #tpu.memory_space<vmem>>, %arg10: memref<1x32xf32, #tpu.memory_space<vmem>>, %arg11: memref<1x8x32xf32, #tpu.memory_space<vmem>>, %arg12: memref<8x64xf32, #tpu.memory_space<vmem>>, %arg13: memref<8x64xf32, #tpu.memory_space<vmem>>) attributes {dimension_semantics = [#tpu.dimension_semantics<parallel>, #tpu.dimension_semantics<arbitrary>], iteration_bounds = array<i64: 2, 1>, scalar_prefetch = 0 : i64, scratch_operands = 2 : i64, tpu.core_type = #tpu.core_type<tc>, window_params = [{transform_indices = @transform_0, window_bounds = array<i64: 1, 8, 32>}, {transform_indices = @transform_1, window_bounds = array<i64: 1, 8, 32>}, {pipeline_mode = #tpu.pipeline_mode<synchronous>, transform_indices = @transform_2, window_bounds = array<i64: 32, 64>}, {pipeline_mode = #tpu.pipeline_mode<synchronous>, transform_indices = @transform_3, window_bounds = array<i64: 32, 64>}, {pipeline_mode = #tpu.pipeline_mode<synchronous>, transform_indices = @transform_4, window_bounds = array<i64: 32, 64>}, {pipeline_mode = #tpu.pipeline_mode<synchronous>, transform_indices = @transform_5, window_bounds = array<i64: 4, 64>}, {pipeline_mode = #tpu.pipeline_mode<synchronous>, transform_indices = @transform_6, window_bounds = array<i64: 4, 64>}, {pipeline_mode = #tpu.pipeline_mode<synchronous>, transform_indices = @transform_7, window_bounds = array<i64: 64, 32>}, {pipeline_mode = #tpu.pipeline_mode<synchronous>, transform_indices = @transform_8, window_bounds = array<i64: 1, 32>}, {transform_indices = @transform_9, window_bounds = array<i64: 1, 8, 32>}]} {
    %c0_i32 = arith.constant 0 : i32
    %0 = arith.cmpi eq, %arg1, %c0_i32 : i32
    %1 = arith.extui %0 : i1 to i32
    %c0_i32_0 = arith.constant 0 : i32
    %2 = arith.cmpi ne, %1, %c0_i32_0 : i32
    scf.if %2 {
      %c0_26 = arith.constant 0 : index
      %c0_27 = arith.constant 0 : index
      %c0_28 = arith.constant 0 : index
      %43 = vector.load %arg2[%c0_26, %c0_27, %c0_28] : memref<1x8x32xf32, #tpu.memory_space<vmem>>, vector<1x8x32xf32>
      %44 = vector.shape_cast %43 : vector<1x8x32xf32> to vector<8x32xf32>
      %c0_29 = arith.constant 0 : index
      %c0_30 = arith.constant 0 : index
      %45 = vector.load %arg5[%c0_29, %c0_30] : memref<32x64xf32, #tpu.memory_space<vmem>>, vector<32x64xf32>
      %cst_31 = arith.constant dense<0.000000e+00> : vector<8x64xf32>
      %46 = tpu.matmul %44, %45, %cst_31 {dimension_numbers = #tpu.dot_dimension_numbers<[1], [0], [0], [1], [0, 0, 1, 1], [], []>} : vector<8x32xf32>, vector<32x64xf32>, vector<8x64xf32> -> vector<8x64xf32>
      %c0_32 = arith.constant 0 : index
      %c0_33 = arith.constant 0 : index
      %47 = vector.load %arg12[%c0_32, %c0_33] : memref<8x64xf32, #tpu.memory_space<vmem>>, vector<8x64xf32>
      tpu.vector_store %arg12[%c0_32, %c0_33], %46 {strides = array<i32>} : memref<8x64xf32, #tpu.memory_space<vmem>>, vector<8x64xf32>,
      %c0_34 = arith.constant 0 : index
      %c0_35 = arith.constant 0 : index
      %48 = vector.load %arg6[%c0_34, %c0_35] : memref<32x64xf32, #tpu.memory_space<vmem>>, vector<32x64xf32>
      %cst_36 = arith.constant dense<0.000000e+00> : vector<8x64xf32>
      %49 = tpu.matmul %44, %48, %cst_36 {dimension_numbers = #tpu.dot_dimension_numbers<[1], [0], [0], [1], [0, 0, 1, 1], [], []>} : vector<8x32xf32>, vector<32x64xf32>, vector<8x64xf32> -> vector<8x64xf32>
      %c0_37 = arith.constant 0 : index
      %c0_38 = arith.constant 0 : index
      %50 = vector.load %arg13[%c0_37, %c0_38] : memref<8x64xf32, #tpu.memory_space<vmem>>, vector<8x64xf32>
      tpu.vector_store %arg13[%c0_37, %c0_38], %49 {strides = array<i32>} : memref<8x64xf32, #tpu.memory_space<vmem>>, vector<8x64xf32>,
    } else {
    }
    %c0 = arith.constant 0 : index
    %c0_1 = arith.constant 0 : index
    %c0_2 = arith.constant 0 : index
    %3 = vector.load %arg3[%c0, %c0_1, %c0_2] : memref<1x8x32xf32, #tpu.memory_space<vmem>>, vector<1x8x32xf32>
    %4 = vector.shape_cast %3 : vector<1x8x32xf32> to vector<8x32xf32>
    %c0_3 = arith.constant 0 : index
    %c0_4 = arith.constant 0 : index
    %5 = vector.load %arg4[%c0_3, %c0_4] : memref<32x64xf32, #tpu.memory_space<vmem>>, vector<32x64xf32>
    %cst = arith.constant dense<0.000000e+00> : vector<8x64xf32>
    %6 = tpu.matmul %4, %5, %cst {dimension_numbers = #tpu.dot_dimension_numbers<[1], [0], [0], [1], [0, 0, 1, 1], [], []>} : vector<8x32xf32>, vector<32x64xf32>, vector<8x64xf32> -> vector<8x64xf32>
    %c0_5 = arith.constant 0 : index
    %c0_6 = arith.constant 0 : index
    %7 = vector.load %arg7[%c0_5, %c0_6] : memref<4x64xf32, #tpu.memory_space<vmem>>, vector<4x64xf32>
    %8 = vector.shape_cast %6 : vector<8x64xf32> to vector<1x8x64xf32>
    %9 = vector.shape_cast %7 : vector<4x64xf32> to vector<4x1x64xf32>
    %10 = vector.broadcast %8 : vector<1x8x64xf32> to vector<4x8x64xf32>
    %11 = vector.broadcast %9 : vector<4x1x64xf32> to vector<4x8x64xf32>
    %12 = arith.mulf %10, %11 : vector<4x8x64xf32>
    %13 = vector.shape_cast %12 : vector<4x8x64xf32> to vector<32x64xf32>
    %c0_7 = arith.constant 0 : index
    %c0_8 = arith.constant 0 : index
    %14 = vector.load %arg12[%c0_7, %c0_8] : memref<8x64xf32, #tpu.memory_space<vmem>>, vector<8x64xf32>
    %15 = tpu.transpose %14, [1, 0] : vector<8x64xf32> -> vector<64x8xf32>
    %cst_9 = arith.constant dense<0.000000e+00> : vector<32x8xf32>
    %16 = tpu.matmul %13, %15, %cst_9 {dimension_numbers = #tpu.dot_dimension_numbers<[1], [0], [0], [1], [0, 0, 1, 1], [], []>} : vector<32x64xf32>, vector<64x8xf32>, vector<32x8xf32> -> vector<32x8xf32>
    %cst_10 = arith.constant dense<0xFF800000> : vector<32xf32>
    %17 = vector.multi_reduction <maximumf>, %16, %cst_10 [1] : vector<32x8xf32> to vector<32xf32>
    %18 = vector.shape_cast %17 : vector<32xf32> to vector<32x1xf32>
    %19 = vector.broadcast %18 : vector<32x1xf32> to vector<32x8xf32>
    %20 = arith.subf %16, %19 : vector<32x8xf32>
    %21 = math.exp %20 : vector<32x8xf32>
    %cst_11 = arith.constant dense<0.000000e+00> : vector<32xf32>
    %22 = vector.multi_reduction <add>, %21, %cst_11 [1] : vector<32x8xf32> to vector<32xf32>
    %23 = vector.shape_cast %22 : vector<32xf32> to vector<32x1xf32>
    %24 = tpu.reciprocal %23 : vector<32x1xf32> -> vector<32x1xf32>
    %25 = vector.broadcast %24 : vector<32x1xf32> to vector<32x8xf32>
    %26 = arith.mulf %21, %25 : vector<32x8xf32>
    %c0_12 = arith.constant 0 : index
    %c0_13 = arith.constant 0 : index
    %27 = vector.load %arg13[%c0_12, %c0_13] : memref<8x64xf32, #tpu.memory_space<vmem>>, vector<8x64xf32>
    %cst_14 = arith.constant dense<0.000000e+00> : vector<32x64xf32>
    %28 = tpu.matmul %26, %27, %cst_14 {dimension_numbers = #tpu.dot_dimension_numbers<[1], [0], [0], [1], [0, 0, 1, 1], [], []>} : vector<32x8xf32>, vector<8x64xf32>, vector<32x64xf32> -> vector<32x64xf32>
    %c0_15 = arith.constant 0 : index
    %c0_16 = arith.constant 0 : index
    %29 = vector.load %arg8[%c0_15, %c0_16] : memref<4x64xf32, #tpu.memory_space<vmem>>, vector<4x64xf32>
    %30 = vector.shape_cast %28 : vector<32x64xf32> to vector<4x8x64xf32>
    %31 = vector.shape_cast %29 : vector<4x64xf32> to vector<4x1x64xf32>
    %32 = vector.broadcast %31 : vector<4x1x64xf32> to vector<4x8x64xf32>
    %33 = arith.mulf %30, %32 : vector<4x8x64xf32>
    %cst_17 = arith.constant dense<0.000000e+00> : vector<8x64xf32>
    %34 = vector.multi_reduction <add>, %33, %cst_17 [0] : vector<4x8x64xf32> to vector<8x64xf32>
    %c0_18 = arith.constant 0 : index
    %c0_19 = arith.constant 0 : index
    %35 = vector.load %arg9[%c0_18, %c0_19] : memref<64x32xf32, #tpu.memory_space<vmem>>, vector<64x32xf32>
    %cst_20 = arith.constant dense<0.000000e+00> : vector<8x32xf32>
    %36 = tpu.matmul %34, %35, %cst_20 {dimension_numbers = #tpu.dot_dimension_numbers<[1], [0], [0], [1], [0, 0, 1, 1], [], []>} : vector<8x64xf32>, vector<64x32xf32>, vector<8x32xf32> -> vector<8x32xf32>
    %c0_21 = arith.constant 0 : index
    %c0_22 = arith.constant 0 : index
    %37 = vector.load %arg10[%c0_21, %c0_22] : memref<1x32xf32, #tpu.memory_space<vmem>>, vector<1x32xf32>
    %38 = vector.broadcast %37 : vector<1x32xf32> to vector<8x32xf32>
    %39 = arith.addf %36, %38 : vector<8x32xf32>
    %c0_23 = arith.constant 0 : index
    %c0_24 = arith.constant 0 : index
    %c0_25 = arith.constant 0 : index
    %40 = vector.load %arg11[%c0_23, %c0_24, %c0_25] : memref<1x8x32xf32, #tpu.memory_space<vmem>>, vector<1x8x32xf32>
    %41 = vector.shape_cast %40 : vector<1x8x32xf32> to vector<8x32xf32>
    %42 = vector.shape_cast %39 : vector<8x32xf32> to vector<1x8x32xf32>
    tpu.vector_store %arg11[%c0_23, %c0_24, %c0_25], %42 {strides = array<i32>} : memref<1x8x32xf32, #tpu.memory_space<vmem>>, vector<1x8x32xf32>,
    return
  }
  func.func @transform_0(%arg0: i32, %arg1: i32) -> (i32, i32, i32) {
    %c0_i32 = arith.constant 0 : i32
    %c0_i32_0 = arith.constant 0 : i32
    %c0_i32_1 = arith.constant 0 : i32
    return %arg0, %c0_i32, %c0_i32_0 : i32, i32, i32
  }
  func.func @transform_1(%arg0: i32, %arg1: i32) -> (i32, i32, i32) {
    %c0_i32 = arith.constant 0 : i32
    %c0_i32_0 = arith.constant 0 : i32
    return %arg0, %arg1, %c0_i32 : i32, i32, i32
  }
  func.func @transform_2(%arg0: i32, %arg1: i32) -> (i32, i32) {
    %c0_i32 = arith.constant 0 : i32
    %c0_i32_0 = arith.constant 0 : i32
    %c0_i32_1 = arith.constant 0 : i32
    return %c0_i32, %c0_i32_0 : i32, i32
  }
  func.func @transform_3(%arg0: i32, %arg1: i32) -> (i32, i32) {
    %c0_i32 = arith.constant 0 : i32
    %c0_i32_0 = arith.constant 0 : i32
    %c0_i32_1 = arith.constant 0 : i32
    return %c0_i32, %c0_i32_0 : i32, i32
  }
  func.func @transform_4(%arg0: i32, %arg1: i32) -> (i32, i32) {
    %c0_i32 = arith.constant 0 : i32
    %c0_i32_0 = arith.constant 0 : i32
    %c0_i32_1 = arith.constant 0 : i32
    return %c0_i32, %c0_i32_0 : i32, i32
  }
  func.func @transform_5(%arg0: i32, %arg1: i32) -> (i32, i32) {
    %c0_i32 = arith.constant 0 : i32
    %c0_i32_0 = arith.constant 0 : i32
    %c0_i32_1 = arith.constant 0 : i32
    return %c0_i32, %c0_i32_0 : i32, i32
  }
  func.func @transform_6(%arg0: i32, %arg1: i32) -> (i32, i32) {
    %c0_i32 = arith.constant 0 : i32
    %c0_i32_0 = arith.constant 0 : i32
    %c0_i32_1 = arith.constant 0 : i32
    return %c0_i32, %c0_i32_0 : i32, i32
  }
  func.func @transform_7(%arg0: i32, %arg1: i32) -> (i32, i32) {
    %c0_i32 = arith.constant 0 : i32
    %c0_i32_0 = arith.constant 0 : i32
    %c0_i32_1 = arith.constant 0 : i32
    return %c0_i32, %c0_i32_0 : i32, i32
  }
  func.func @transform_8(%arg0: i32, %arg1: i32) -> (i32, i32) {
    %c0_i32 = arith.constant 0 : i32
    %c0_i32_0 = arith.constant 0 : i32
    %c0_i32_1 = arith.constant 0 : i32
    return %c0_i32, %c0_i32_0 : i32, i32
  }
  func.func @transform_9(%arg0: i32, %arg1: i32) -> (i32, i32, i32) {
    %c0_i32 = arith.constant 0 : i32
    %c0_i32_0 = arith.constant 0 : i32
    return %arg0, %arg1, %c0_i32 : i32, i32, i32
  }
}

</mosaic_0001>

<bundles_post_ra>
// kernel: tpu_custom_call.1
= control target key start
LH: loop header
LB: loop body
LE: loop exit
PB: predicated region body
PF: predicated region fallthrough
CT: control target
= control target key end

     0   :  { %s2015_s0 = inlined_call_operand.hbm [shape: f32[2,8,32], index: 0, kind: input, shape index: {}]   ;;  %s2016_s1 = inlined_call_operand.hbm [shape: f32[2,8,32], index: 1, kind: input, shape index: {}]   ;;  %s2017_s2 = inlined_call_operand.vmem [shape: f32[32,64], index: 2, kind: input, shape index: {}]   ;;  %s2018_s3 = inlined_call_operand.vmem [shape: f32[32,64], index: 3, kind: input, shape index: {}]   ;;  %s2019_s4 = inlined_call_operand.vmem [shape: f32[32,64], index: 4, kind: input, shape index: {}]   ;;  %s2020_s5 = inlined_call_operand.vmem [shape: f32[4,64], index: 5, kind: input, shape index: {}]   ;;  %s2021_s6 = inlined_call_operand.vmem [shape: f32[4,64], index: 6, kind: input, shape index: {}]   ;;  %s2022_s7 = inlined_call_operand.vmem [shape: f32[64,32], index: 7, kind: input, shape index: {}]   ;;  %s2023_s8 = inlined_call_operand.vmem [shape: f32[1,32], index: 8, kind: input, shape index: {}]   ;;  %s2024_s9 = inlined_call_operand.hbm [shape: f32[2,8,32], index: 9, kind: output, shape index: {}]  }
   0x1   :  { %2031 = sst [smem:[#allocation16_spill]] %s2015_s0 }
   0x2   :  { %14 = vsyncpa [#allocation5], 0 }
   0x3   :  { %16 = vsyncpa [#allocation5 + $0x1], 0 }
   0x4   :  { %17 = vsyncpa [#allocation8], 0 }
   0x5   :  { %19 = vsyncpa [#allocation8 + $0x1], 0 }
   0x6   :  { %20 = vsyncpa [#allocation6], 0 }
   0x7   :  { %22 = vsyncpa [#allocation6 + $0x1], 0  ;;  %s1656_s30 = smov 0   ;;  %s1658_s10 = smov 0  }
   0x8   :  { %s1660_s11 = smov 0   ;;  %s1662_s12 = smov 0  }
   0x9   :  { %s1664_s13 = smov 0   ;;  %s1666_s14 = smov 0  }
   0xa LB: > { %2032 = sst [smem:[#allocation13_spill]] %s1593_s13  ;;  %s1200_s15 = sadd.s32 4294967295, %s1597_s14   ;;  %s1597_s14 = sphi %s1666_s14, %s28_s14   ;;  %s1593_s13 = sphi %s1664_s13, %s2053_s13   ;;  %s1589_s12 = sphi %s1662_s12, %s2052_s12   ;;  %s1585_s11 = sphi %s1660_s11, %s2056_s11   ;;  %s1581_s10 = sphi %s1658_s10, %s2055_s10   ;;  %s1577_s30 = sphi %s1656_s30, %s2054_s30  }
   0xb   : > { %s1201_s16 = sadd.s32 4294967294, %s1597_s14   ;;  %s40_s17 = sadd.s32 1, %s1593_s13 }
   0xc   : > { %s47_s18 = sadd.s32 1, %s1585_s11  ;;  %p42_p0 = scmp.ge.s32.totalorder %s40_s17, 2 }
   0xd   : > { %p54_p1 = scmp.ne.s32.totalorder %s1585_s11, %s1581_s10  ;;  %p55_p2 = scmp.eq.s32.totalorder %s1597_s14, 0 }
   0xe   : > { %p60_p3 = scmp.ne.s32.totalorder %s1581_s10, %s1577_s30  ;;  %s2058_s17 = smov (%p42_p0, %s40_s17), 0 }
   0xf   : > { %2033 = sst [smem:[#allocation14_spill]] %s2058_s17  ;;  %p1697_p4 = por %p55_p2, %p54_p1 }
  0x10   : > { %p61_p5 = scmp.eq.s32.totalorder %s1200_s15, 0  ;;  %s44_s20 = ssub.s32 %s1593_s13, %s2058_s17 }
  0x11   : > { %p261_p6 = scmp.eq.s32.totalorder %s1200_s15, 1  ;;  %p45_p7 = scmp.eq.s32.totalorder %s44_s20, 0 }
  0x12   : > { %p1703_p8 = por %p61_p5, %p60_p3  ;;  %p267_p10 = scmp.eq.s32.totalorder %s1201_s16, 1 }
  0x13   : > { %p1707_p9 = por %p261_p6, %p54_p1  ;;  %p1381_p13 = scmp.lt.s32.totalorder %s1597_s14, 2 }
  0x14   : > { %s2035_s21 = scalar_select %p1703_p8, 1, 0 }
  0x15   : > { %s2036_s22 = scalar_select %p1707_p9, 1, 0 }
  0x16   : > { %s1712_s23 = scalar_select %p45_p7, %s1585_s11, %s47_s18  }
  0x17   : > { %p1714_p11 = por %p267_p10, %p60_p3  ;;  %s1721_s25 = sand.u32 1, %s1585_s11  }
  0x18   : > { %2037 = sst [smem:[#allocation15_spill]] %s1712_s23  ;;  %s2025_s26 = sshll.u32 %s1721_s25, 3 }
  0x19   : > { %s2038_s24 = scalar_select %p1714_p11, 1, 0 }
  0x1a   : > { %s2026_s27 = sshll.u32 %s1593_s13, 7  ;;  %s2039_s0 = sld [smem:[#allocation16_spill]] }
  0x1b   : > { %s312_s16 = scalar_lea.vmem [#allocation4], %s2025_s26  ;;  %p1738_p0 = pnand %p1381_p13, %p1697_p4 }
  0x1c   : > { %s319_s18 = sshll.u32 %s312_s16, 4  ;;  %s309_s28 = scalar_lea.sflag [#allocation5], %s1721_s25  ;;  %s1734_s18 = int_to_ptr.vmem [resolvable:$true] %s319_s18 }
  0x1d   : > { %p1453_p5 = pneg %p1738_p0 }
  0x20   : > { %s1730_s15 = scalar_lea.hbm %s2039_s0, %s2026_s27  ;;  %s1456_s19 = scalar_lea.hbm %s2039_s0, 256 }
  0x21   : > { %s1451_s29 = scalar_lea.hbm %s1730_s15, 128  ;;  %p1457_p4 = scmp.lt.u32.totalorder %s1730_s15, %s2039_s0 }
  0x22   : > { %p1452_p3 = scmp.ne.s32.totalorder %s1730_s15, %s1451_s29  ;;  %p1458_p10 = scmp.lt.u32.totalorder %s1456_s19, %s1451_s29 }
  0x23   : > { %p1460_p12 = scmp.lt.u32.totalorder %s1451_s29, %s1730_s15 }
  0x24   : > { %p1454_p6 = pnand %p1453_p5, %p1452_p3  ;;  %p1459_p13 = por %p1458_p10, %p1457_p4 }
  0x26   : > { %p1455_p7 = pneg %p1454_p6  ;;  %p1461_p1 = por %p1460_p12, %p1459_p13 }
  0x28   : > { %p1462_p2 = pnand %p1461_p1, %p1455_p7 }
  0x2a   : > { %1465 = shalt.err (!%p1462_p2)
}
  0x2b   : > { %s1466_s23 = scalar_lea.vmem %s1734_s18, 128  ;;  %s1599_s26 = smov [#allocation4]  }
  0x2c   : > { %p1467_p3 = scmp.ne.s32.totalorder %s1734_s18, %s1466_s23  ;;  %s1471_s16 = sshll.u32 %s1599_s26, 4  ;;  %s1472_s16 = int_to_ptr.vmem [resolvable:$false] %s1471_s16 }
  0x2d   : > { %s1473_s17 = scalar_lea.vmem %s1472_s16, 256  ;;  %p1474_p9 = scmp.lt.s32.totalorder %s1734_s18, %s1472_s16 }
  0x2e   : > { %p1469_p6 = pnand %p1467_p3, %p1453_p5  ;;  %p1475_p4 = scmp.lt.s32.totalorder %s1473_s17, %s1466_s23 }
  0x30   : > { %p1470_p11 = pneg %p1469_p6  ;;  %p1476_p10 = por %p1475_p4, %p1474_p9 }
  0x32   : > { %p1477_p12 = pnand %p1476_p10, %p1470_p11 }
  0x34   : > { %1480 = shalt.err (!%p1477_p12)
}
  0x35   : > { %1373 = dma.hbm_to_vmem [thread:$0]  (!%p1738_p0), %s1730_s15, 128, %s1734_s18, %s309_s28  }
  0x36   : > { %p2041_p1 = scmp.lt.s32.totalorder %s1597_s14, 3  ;;  %p2042_p2 = scmp.ge.s32.totalorder %s1597_s14, 1 }
  0x37   : > { %s2044_s23 = sshll.u32 %s1593_s13, 7  ;;  %s2045_s16 = sshll.u32 %s1721_s25, 3 }
  0x38   : > { %p1774_p7 = pnand %p2042_p2, %p2041_p1  ;;  %s1783_s26 = scalar_lea.hbm %s2016_s1, %s2044_s23 }
  0x39   : > { %s330_s17 = scalar_lea.vmem [#allocation7], %s2045_s16  ;;  %s327_s15 = scalar_lea.sflag [#allocation8], %s1721_s25 }
  0x3a   : > { %s2043_s27 = scalar_select %p1774_p7, 1, 0 }
  0x3b   : > { %s338_s0 = sshll.u32 %s330_s17, 4  ;;  %s1481_s18 = scalar_lea.hbm %s1783_s26, 128  ;;  %s339_s0 = int_to_ptr.vmem [resolvable:$true] %s338_s0 }
  0x3c   : > { %p1482_p9 = scmp.ne.s32.totalorder %s1783_s26, %s1481_s18  ;;  %s1486_s23 = scalar_lea.hbm %s2016_s1, 256 }
  0x3d   : > { %p1487_p3 = scmp.lt.u32.totalorder %s1783_s26, %s2016_s1  ;;  %p1488_p6 = scmp.lt.u32.totalorder %s1486_s23, %s1481_s18 }
  0x3e   : > { %p1484_p11 = pnand %p1482_p9, %p1453_p5  ;;  %p1490_p10 = scmp.lt.u32.totalorder %s1481_s18, %s1783_s26 }
  0x3f   : > { %p1489_p4 = por %p1488_p6, %p1487_p3 }
  0x40   : > { %p1485_p13 = pneg %p1484_p11 }
  0x41   : > { %p1491_p12 = por %p1490_p10, %p1489_p4 }
  0x43   : > { %p1492_p1 = pnand %p1491_p12, %p1485_p13 }
  0x45   : > { %1495 = shalt.err (!%p1492_p1)
}
  0x46   : > { %s1496_s25 = scalar_lea.vmem %s339_s0, 128  ;;  %s1600_s16 = smov [#allocation7]  }
  0x47   : > { %p1497_p2 = scmp.ne.s32.totalorder %s339_s0, %s1496_s25  ;;  %s1501_s13 = sshll.u32 %s1600_s16, 4  ;;  %s1502_s13 = int_to_ptr.vmem [resolvable:$false] %s1501_s13 }
  0x48   : > { %s1503_s17 = scalar_lea.vmem %s1502_s13, 256  ;;  %p1504_p8 = scmp.lt.s32.totalorder %s339_s0, %s1502_s13 }
  0x49   : > { %p1499_p9 = pnand %p1497_p2, %p1453_p5  ;;  %p1505_p7 = scmp.lt.s32.totalorder %s1503_s17, %s1496_s25 }
  0x4b   : > { %p1500_p11 = pneg %p1499_p9  ;;  %p1506_p3 = por %p1505_p7, %p1504_p8 }
  0x4d   : > { %p1507_p6 = pnand %p1506_p3, %p1500_p11 }
  0x4f   : > { %1510 = shalt.err (!%p1507_p6)
}
  0x50   : > { %1376 = dma.hbm_to_vmem [thread:$0]  (!%p1738_p0), %s1783_s26, 128, %s339_s0, %s327_s15  }
  0x51   : > { %p2046_p13 = scmp.ne.s32.totalorder %s2043_s27, 0 }
  0x52   : > { %s1810_s18 = sand.u32 (!%p2046_p13), 1, %s1581_s10   ;;  %p2047_p8 = scmp.ne.s32.totalorder (!%p2046_p13), %s2035_s21, 0 }
  0x53   : > { %347 = sbr.rel (%p2046_p13) target bundleno = 1310 (0x51e), region = 56  ;;  %s1813_s28 = sshll.u32 (!%p2046_p13), %s1810_s18, 3 }
  0x54   : > { %s350_s23 = scalar_lea.sflag (!%p2046_p13), [#allocation5], %s1810_s18  ;;  %s353_s29 = scalar_lea.vmem (!%p2046_p13), [#allocation4], %s1813_s28 }
  0x5a   : > { %1564 = dma.done.wait (%p2047_p8), %s350_s23, 128  }
  0x5b   : > { %1566 = vsyncadd (%p2047_p8), %s350_s23, 4294967168  ;;  %s359_s0 = scalar_lea.sflag [#allocation8], %s1810_s18  ;;  %s362_s20 = scalar_lea.vmem [#allocation7], %s1813_s28 }
  0x5c   : > { %1568 = dma.done.wait (%p2047_p8), %s359_s0, 128  }
  0x5d   : > { %1570 = vsyncadd (%p2047_p8), %s359_s0, 4294967168  ;;  %v1601_v0 = vmov 0.0|0.0   ;;  %vm1602_vm0 = vmmov 0   ;;  %v1603_v1 = vmov 0.0   ;;  %v407_v2 = vld [vmem:[%s2018_s3] sm:$0xff]  ;;  %v408_v3 = vld [vmem:[%s2018_s3 + $0x8] sm:$0xff]  ;;  %v654_v24 = vlaneseq }
  0x5e   : > { %1334 = vmatprep.subr.bf16.mxu0 %v1601_v0  ;;  %1274 = vmatprep.mubr.msk.f32.mxu0 %vm1602_vm0, %v1603_v1  ;;  %v409_v4 = vld [vmem:[%s2018_s3 + $0x10] sm:$0xff]  ;;  %v1335_v5 = vpack.c.bf16 %v408_v3, %v407_v2  ;;  %v410_v6 = vld [vmem:[%s2018_s3 + $0x18] sm:$0xff]  ;;  %v487_v8 = vld [vmem:[%s2019_s4] sm:$0xff]  ;;  %vm411_vm1 = vcmask 261120   ;;  %v1604_v22 = vmov 1966171168  }
  0x5f   : > { %1340 = vmatprep.subr.bf16.mxu1 %v1601_v0  ;;  %1285 = vmatprep.mubr.msk.f32.mxu1 %vm1602_vm0, %v1603_v1  ;;  %v1338_v7 = vpack.c.bf16 %v410_v6, %v409_v4  ;;  %v488_v9 = vld [vmem:[%s2019_s4 + $0x8] sm:$0xff]  ;;  %v563_v10 = vld [vmem:[%s2017_s2] sm:$0xff]  ;;  %v406_v13 = vld [vmem:[%s353_s29] sm:$0xff]  ;;  %v652_v23 = vunpack.c.l.s4 %v1604_v22  ;;  %v655_v26 = vshrl.u32 %v654_v24, 7  ;;  %vm485_vm2 = vcmask 523264   ;;  %s1229_s29 = sshll.u32 %s1589_s12, 7 }
  0x60   : > { %1336 = vmatpush3.bf16.msra.mxu0 %v1335_v5  ;;  %v564_v11 = vld [vmem:[%s2017_s2 + $0x8] sm:$0xff]  ;;  %v1341_v12 = vpack.c.bf16 %v488_v9, %v487_v8  ;;  %v565_v15 = vld [vmem:[%s2017_s2 + $0x10] sm:$0xff]  ;;  %v566_v16 = vld [vmem:[%s2017_s2 + $0x18] sm:$0xff]  ;;  %vm793_vm3 = vcmask 64512   ;;  %s401_s23 = scalar_lea.vmem [#allocation9], %s1813_s28  ;;  %s1965_s26 = scalar_lea.hbm %s2024_s9, %s1229_s29 }
  0x61   : > { %1337 = vmatprep.subr.bf16.mxu0 %v1601_v0  ;;  %v1347_v14 = vpack.c.bf16 %v564_v11, %v563_v10  ;;  %v1350_v17 = vpack.c.bf16 %v566_v16, %v565_v15  ;;  %v562_v18 = vld [vmem:[%s362_s20] sm:$0xff]  ;;  %v489_v19 = vld [vmem:[%s2019_s4 + $0x10] sm:$0xff]  ;;  %v490_v20 = vld [vmem:[%s2019_s4 + $0x18] sm:$0xff]  ;;  %v653_v25 = vunpack.c.0.s8 %v652_v23  ;;  %v1887_v33 = vsub.s32 0, %v655_v26  ;;  %s1097_s0 = sshll.u32 %s401_s23, 4  ;;  %s1083_s15 = scalar_lea.sflag [#allocation6], %s1810_s18  ;;  %s1967_s0 = int_to_ptr.vmem [resolvable:$true] %s1097_s0 }
  0x62   : > { %1342 = vmatpush3.bf16.msra.mxu1 %v1341_v12  ;;  %v1344_v21 = vpack.c.bf16 %v490_v20, %v489_v19  ;;  %v1215_v27 = vld.sshfl [vmem:[%s2020_s5] sm:$0x33 pattern:$0x75316420]  ;;  %s1511_s21 = scalar_lea.vmem %s1967_s0, 128  ;;  %p2048_p5 = scmp.ne.s32.totalorder %s2036_s22, 0 }
  0x63   : > { %1343 = vmatprep.subr.bf16.mxu1 %v1601_v0  ;;  %v1883_v28 = vsub.s32 %v653_v25, %v655_v26  ;;  %v650_v29 = vcombine.high %v1215_v27, %v1215_v27  ;;  %v993_v16 = vld [vmem:[%s2022_s7] sm:$0xff]  ;;  %p1512_p0 = scmp.ne.s32.totalorder %s1967_s0, %s1511_s21  ;;  %s1605_s12 = smov [#allocation9]  }
  0x64   : > { %1339 = vmatpush3.bf16.msra.mxu0 %v1338_v7  ;;  %s1515_s28 = sshll.u32 %s1605_s12, 4  ;;  %s1516_s28 = int_to_ptr.vmem [resolvable:$false] %s1515_s28 }
  0x65   : > { %1346 = vmatprep.subr.bf16.mxu0 %v1601_v0  ;;  %v657_v31 = vrot.slane %v1215_v27, %v1883_v28  ;;  %v664_v34 = vrot.slane %v650_v29, %v1883_v28  ;;  %p1513_p7 = pnand %p1512_p0, %p2048_p5  ;;  %s1517_s19 = scalar_lea.vmem %s1516_s28, 256 }
  0x66   : > { %1345 = vmatpush3.bf16.msra.mxu1 %v1344_v21  ;;  %p1518_p10 = scmp.lt.s32.totalorder %s1967_s0, %s1516_s28  ;;  %p1519_p12 = scmp.lt.s32.totalorder %s1517_s19, %s1511_s21 }
  0x67   : > { %1275 = vmatmul.mubr.msk.f32.vlgmr.msra.gmra.mrb[0].mxu0 %vm411_vm1, %v406_v13  ;;  %v665_v35 = vcombine.high %v657_v31, %v657_v31  ;;  %v670_v36 = vrot.slane %v657_v31, %v1887_v33  ;;  %v674_v37 = vrot.slane %v664_v34, %v1887_v33  ;;  %v666_v38 = vcombine.high %v664_v34, %v664_v34  ;;  %v996_v34 = vld [vmem:[%s2022_s7 + $0x18] sm:$0xff]  ;;  %p1514_p4 = pneg %p1513_p7 }
  0x68   : > { %1348 = vmatpush3.bf16.msra.mxu0 %v1347_v14  ;;  %1296 = vmatprep.mubr.msk.f32.mxu0 %vm1602_vm0, %v1603_v1  ;;  %p1520_p1 = por %p1519_p12, %p1518_p10 }
  0x69   : > { %1349 = vmatprep.subr.bf16.mxu0 %v1601_v0  ;;  %1286 = vmatmul.mubr.msk.f32.vlgmr.msra.gmra.mrb[0].mxu1 %vm411_vm1, %v406_v13  ;;  %v678_v40 = vrot.slane %v665_v35, %v1887_v33  ;;  %v682_v45 = vrot.slane %v666_v38, %v1887_v33 }
  0x6a   : > { %p1521_p2 = pnand %p1520_p1, %p1514_p4 }
  0x6c   : > { %1351 = vmatpush3.bf16.msra.mxu0 %v1350_v17  ;;  %v994_v17 = vld [vmem:[%s2022_s7 + $0x8] sm:$0xff] }
  0x6f   : > { %1297 = vmatmul.mubr.msk.f32.vlgmr.msra.gmra.mrb[2].mxu0 %vm411_vm1, %v562_v18  ;;  %v1353_v18 = vpack.c.bf16 %v994_v17, %v993_v16 }
 0x13a   : > { %v481_v30 = vpop.f32.mrb[0].mxu0 }
 0x13b   : > { %486 = vst.msk [vmem:[#allocation2] sm:$0xff] %vm485_vm2, %v481_v30  ;;  %v1276_v32 = vpop.f32.mrb[1].mxu0 }
 0x13c   : > { %v557_v48 = vpop.f32.mrb[0].mxu1  ;;  %v995_v32 = vld [vmem:[%s2022_s7 + $0x10] sm:$0xff] }
 0x13d   : > { %561 = vst.msk [vmem:[#allocation3] sm:$0xff] %vm485_vm2, %v557_v48  ;;  %v1287_v49 = vpop.f32.mrb[1].mxu1  ;;  %v1356_v35 = vpack.c.bf16 %v996_v34, %v995_v32 }
 0x142   : > { %v637_v39 = vpop.f32.mrb[2].mxu0  ;;  %v691_v41 = vld [vmem:[#allocation2] sm:$0xff] }
 0x143   : > { %v687_v42 = vmul.f32 %v670_v36, %v637_v39  ;;  %v688_v43 = vmul.f32 %v674_v37, %v637_v39  ;;  %1299 = vmatprep.subr.msk.mxu1 %vm485_vm2, %v691_v41  ;;  %v1298_v44 = vpop.f32.mrb[3].mxu0  ;;  %v689_v46 = vmul.f32 %v678_v40, %v637_v39  ;;  %v690_v47 = vmul.f32 %v682_v45, %v637_v39  ;;  %v997_v36 = vld [vmem:[%s2022_s7 + $0x20] sm:$0xff]  ;;  %v998_v37 = vld [vmem:[%s2022_s7 + $0x28] sm:$0xff]  ;;  %v999_v39 = vld [vmem:[%s2022_s7 + $0x30] sm:$0xff] }
 0x144   : > { %1300 = vmatpush3.xpose.msk.msra.mxu1 %vm485_vm2, %v691_v41  ;;  %v838_v50 = vld [vmem:[#allocation3] sm:$0xff]  ;;  %v1359_v38 = vpack.c.bf16 %v998_v37, %v997_v36  ;;  %v1000_v40 = vld [vmem:[%s2022_s7 + $0x38] sm:$0xff] }
 0x145   : > { %1301 = vmatprep.mubr.msk.f32.mxu1 %vm485_vm2, %v687_v42  ;;  %1352 = vmatprep.subr.bf16.mxu1 %v1601_v0  ;;  %v1362_v41 = vpack.c.bf16 %v1000_v40, %v999_v39  ;;  %v1225_v42 = vld.sshfl [vmem:[%s2021_s6] sm:$0x33 pattern:$0x75316420] }
 0x146   : > { %1307 = vmatprep.subr.mxu0 %v838_v50  ;;  %v952_v45 = vrot.slane %v1225_v42, %v1883_v28 }
 0x147   : > { %1302 = vmatmul.mubr.msk.f32.vlgmr.msra.gmra.mrb[2].mxu1 %vm485_vm2, %v688_v43  ;;  %1308 = vmatpush3.msra.mxu0 %v838_v50  ;;  %v945_v43 = vcombine.high %v1225_v42, %v1225_v42 }
 0x148   : > { %1304 = vmatprep.mubr.msk.f32.mxu1 %vm485_vm2, %v689_v46  ;;  %1354 = vmatpush3.bf16.msra.mxu1 %v1353_v18  ;;  %v965_v46 = vrot.slane %v952_v45, %v1887_v33  ;;  %v960_v48 = vcombine.high %v952_v45, %v952_v45 }
 0x149   : > { %1355 = vmatprep.subr.bf16.mxu1 %v1601_v0  ;;  %v959_v44 = vrot.slane %v945_v43, %v1883_v28 }
 0x14b   : > { %1305 = vmatmul.mubr.msk.f32.gmra.mrb[4].mxu1 %vm485_vm2, %v690_v47  ;;  %v961_v47 = vcombine.high %v959_v44, %v959_v44 }
 0x14c   : > { %1331 = vmatprep.mubr.msk.f32.mxu1 %vm1602_vm0, %v1603_v1  ;;  %1357 = vmatpush3.bf16.msra.mxu1 %v1356_v35 }
 0x14d   : > { %1358 = vmatprep.subr.bf16.mxu1 %v1601_v0 }
 0x150   : > { %1360 = vmatpush3.bf16.msra.mxu1 %v1359_v38 }
 0x151   : > { %1361 = vmatprep.subr.bf16.mxu1 %v1601_v0  ;;  %v969_v0 = vrot.slane %v959_v44, %v1887_v33 }
 0x154   : > { %1363 = vmatpush3.bf16.msra.mxu1 %v1362_v41 }
 0x21a   : > { %v1303_v51 = vpop.f32.mrb[2].mxu1 }
 0x21b   : > { %v774_v52 = vpop.f32.mrb[3].mxu1  ;;  %v797_v56 = vsel %vm793_vm3, %v1303_v51, -inf }
 0x21c   : > { %v794_v53 = vsel %vm793_vm3, %v774_v52, -inf }
 0x21d   : > { %795 = vmax.xlane.f32.xlu0 %v794_v53  ;;  %v977_v53 = vrot.slane %v961_v47, %v1887_v33 }
 0x21e   : > { %v1306_v54 = vpop.f32.mrb[4].mxu1 }
 0x21f   : > { %v784_v55 = vpop.f32.mrb[5].mxu1  ;;  %v803_v58 = vsel %vm793_vm3, %v1306_v54, -inf }
 0x220   : > { %v800_v57 = vsel %vm793_vm3, %v784_v55, -inf }
 0x221   : > { %798 = vmax.xlane.f32.xlu0 %v797_v56  ;;  %801 = vmax.xlane.f32.xlu1 %v800_v57 }
 0x225   : > { %804 = vmax.xlane.f32.xlu1 %v803_v58 }
 0x2aa   : > { %v796_v59 = vpop.xlane.xlu0 %795 }
 0x2ab   : > { %v806_v60 = vsub.f32 %v774_v52, %v796_v59 }
 0x2ad   : > { %v810_v61 = vmul.f32 1.442695, %v806_v60 }
 0x2ae   : > { %v799_v62 = vpop.xlane.xlu0 %798  ;;  %v802_v63 = vpop.xlane.xlu1 %801 }
 0x2af   : > { %1435 = vpow2.f32 %v810_v61  ;;  %v807_v1 = vsub.f32 %v1303_v51, %v799_v62  ;;  %v808_v2 = vsub.f32 %v784_v55, %v802_v63 }
 0x2b1   : > { %v812_v3 = vmul.f32 1.442695, %v807_v1  ;;  %v814_v4 = vmul.f32 1.442695, %v808_v2 }
 0x2b2   : > { %v805_v5 = vpop.xlane.xlu1 %804 }
 0x2b3   : > { %1437 = vpow2.f32 %v812_v3  ;;  %v809_v6 = vsub.f32 %v1306_v54, %v805_v5  ;;  %v973_v54 = vrot.slane %v960_v48, %v1887_v33  ;;  %v1226_v33 = vld [vmem:[%s2023_s8] ss:$0 sm:$0xff] }
 0x2b4   : > { %1439 = vpow2.f32 %v814_v4 }
 0x2b5   : > { %v816_v7 = vmul.f32 1.442695, %v809_v6 }
 0x2b7   : > { %1441 = vpow2.f32 %v816_v7 }
 0x2b9   : > { %v1436_v8 = vpop.eup %1435 }
 0x2ba   : > { %v818_v9 = vsel %vm793_vm3, %v1436_v8, 0.0 }
 0x2bb   : > { %819 = vadd.xlane.f32.xlu0 %v818_v9 }
 0x2bd   : > { %v1438_v10 = vpop.eup %1437 }
 0x2be   : > { %v1440_v11 = vpop.eup %1439  ;;  %v821_v12 = vsel %vm793_vm3, %v1438_v10, 0.0 }
 0x2bf   : > { %822 = vadd.xlane.f32.xlu1 %v821_v12  ;;  %v824_v13 = vsel %vm793_vm3, %v1440_v11, 0.0 }
 0x2c0   : > { %825 = vadd.xlane.f32.xlu0 %v824_v13 }
 0x2c1   : > { %v1442_v14 = vpop.eup %1441 }
 0x2c2   : > { %v827_v15 = vsel %vm793_vm3, %v1442_v14, 0.0 }
 0x2c3   : > { %828 = vadd.xlane.f32.xlu1 %v827_v15 }
 0x348   : > { %v820_v19 = vpop.xlane.xlu0 %819 }
 0x349   : > { %1443 = vrcp.f32 %v820_v19 }
 0x34c   : > { %v823_v20 = vpop.xlane.xlu1 %822 }
 0x34d   : > { %v826_v21 = vpop.xlane.xlu0 %825  ;;  %1445 = vrcp.f32 %v823_v20 }
 0x34e   : > { %1447 = vrcp.f32 %v826_v21 }
 0x350   : > { %v829_v22 = vpop.xlane.xlu1 %828 }
 0x351   : > { %1449 = vrcp.f32 %v829_v22 }
 0x353   : > { %v1444_v23 = vpop.eup %1443 }
 0x354   : > { %v834_v24 = vmul.f32 %v1444_v23, %v1436_v8 }
 0x356   : > { %1309 = vmatprep.mubr.msk.f32.mxu0 %vm793_vm3, %v834_v24 }
 0x357   : > { %v1446_v25 = vpop.eup %1445 }
 0x358   : > { %v1448_v26 = vpop.eup %1447  ;;  %v835_v27 = vmul.f32 %v1446_v25, %v1438_v10 }
 0x359   : > { %v836_v29 = vmul.f32 %v1448_v26, %v1440_v11 }
 0x35a   : > { %1310 = vmatmul.mubr.msk.f32.vlgmr.msra.gmra.mrb[4].mxu0 %vm793_vm3, %v835_v27 }
 0x35b   : > { %v1450_v30 = vpop.eup %1449  ;;  %1312 = vmatprep.mubr.msk.f32.mxu0 %vm793_vm3, %v836_v29 }
 0x35c   : > { %v837_v31 = vmul.f32 %v1450_v30, %v1442_v14 }
 0x35e   : > { %1313 = vmatmul.mubr.msk.f32.gmra.mrb[6].mxu0 %vm793_vm3, %v837_v31 }
 0x42d   : > { %v1311_v49 = vpop.f32.mrb[4].mxu0 }
 0x42e   : > { %v983_v50 = vmul.f32 %v1311_v49, %v969_v0  ;;  %v917_v51 = vpop.f32.mrb[5].mxu0 }
 0x42f   : > { %v982_v52 = vmul.f32 %v965_v46, %v917_v51 }
 0x430   : > { %v987_v55 = vsel %vm485_vm2, %v983_v50, 0.0 }
 0x431   : > { %v986_v28 = vsel %vm485_vm2, %v982_v52, 0.0  ;;  %v1314_v56 = vpop.f32.mrb[6].mxu0 }
 0x432   : > { %v988_v57 = vadd.f32 %v987_v55, %v986_v28  ;;  %v927_v58 = vpop.f32.mrb[7].mxu0  ;;  %v985_v59 = vmul.f32 %v1314_v56, %v977_v53 }
 0x433   : > { %v984_v60 = vmul.f32 %v973_v54, %v927_v58 }
 0x434   : > { %v991_v63 = vsel %vm485_vm2, %v985_v59, 0.0 }
 0x435   : > { %v989_v61 = vsel %vm485_vm2, %v984_v60, 0.0 }
 0x436   : > { %v990_v62 = vadd.f32 %v989_v61, %v988_v57 }
 0x438   : > { %v992_v1 = vadd.f32 %v991_v63, %v990_v62 }
 0x43a   : > { %1332 = vmatmul.mubr.msk.f32.vlgmr.msra.gmra.mrb[6].mxu1 %vm485_vm2, %v992_v1 }
 0x50d   : > { %v1077_v2 = vpop.f32.mrb[6].mxu1 }
 0x50e   : > { %v1078_v3 = vadd.f32 %v1226_v33, %v1077_v2  ;;  %v1333_v4 = vpop.f32.mrb[7].mxu1 }
 0x510   : > { %1081 = vst.msk [vmem:[%s401_s23] sm:$0xff] %vm411_vm1, %v1078_v3 }
 0x511   : > { %1524 = shalt.err (!%p1521_p2)
}
 0x512   : > { %s1525_s18 = scalar_lea.hbm %s1965_s26, 128  ;;  %s1529_s13 = scalar_lea.hbm %s2024_s9, 256 }
 0x513   : > { %p1526_p9 = scmp.ne.s32.totalorder %s1965_s26, %s1525_s18  ;;  %p1530_p6 = scmp.lt.u32.totalorder %s1965_s26, %s2024_s9 }
 0x514   : > { %p1531_p13 = scmp.lt.u32.totalorder %s1529_s13, %s1525_s18  ;;  %p1533_p0 = scmp.lt.u32.totalorder %s1525_s18, %s1965_s26 }
 0x515   : > { %p1527_p11 = pnand %p1526_p9, %p2048_p5 }
 0x516   : > { %p1532_p8 = por %p1531_p13, %p1530_p6 }
 0x517   : > { %p1528_p3 = pneg %p1527_p11 }
 0x518   : > { %p1534_p7 = por %p1533_p0, %p1532_p8 }
 0x51a   : > { %p1535_p4 = pnand %p1534_p7, %p1528_p3 }
 0x51c   : > { %1538 = shalt.err (!%p1535_p4)
}
 0x51d   : > { %1368 = dma.vmem_to_hbm [thread:$0]  (%p2048_p5), %s1967_s0, 128, %s1965_s26, %s1083_s15  }
 0x51e PF: > { %s1109_s23 = sand.u32 1, %s1577_s30   ;;  %p2049_p10 = scmp.ne.s32.totalorder %s2038_s24, 0 }
 0x51f   : > { %p2050_p12 = scmp.ge.s32.totalorder %s1597_s14, 2  ;;  %s1110_s27 = scalar_lea.sflag [#allocation6], %s1109_s23 }
 0x521   : > { %p1378_p1 = pnand %p2050_p12, %p2049_p10 }
 0x523   : > { %1572 = dma.done.wait (!%p1378_p1), %s1110_s27, 128  }
 0x524   : > { %1574 = vsyncadd (!%p1378_p1), %s1110_s27, 4294967168  ;;  %s28_s14 = sadd.s32 1, %s1597_s14   ;;  %s2051_s22 = sld [smem:[#allocation15_spill]] }
 0x525   : > { %p25_p2 = scmp.ge.s32.totalorder %s28_s14, 4   ;;  %s2052_s12 = sld [smem:[#allocation13_spill]] }
 0x526   : > { %s2053_s13 = sld [smem:[#allocation14_spill]]  ;;  %s2054_s30 = smov %s1581_s10 }
 0x527   : > { %s2055_s10 = smov %s1585_s11  ;;  %27 = sbr.rel (!%p25_p2) target bundleno = 10 (0xa), region = 118 }
 0x52a   : > { %s2056_s11 = smov %s2051_s22 }
 0x52e   :  { %1115 = vsyncpa [#allocation5], 1 }
 0x52f   :  { %1117 = vsyncpa [#allocation5 + $0x1], 1 }
 0x530   :  { %1118 = vsyncpa [#allocation8], 1 }
 0x531   :  { %1120 = vsyncpa [#allocation8 + $0x1], 1 }
 0x532   :  { %1121 = vsyncpa [#allocation6], 1 }
 0x533   :  { %1123 = vsyncpa [#allocation6 + $0x1], 1 }

</bundles_post_ra>
